<compile_context>
chip_gen: v5e
topology: v5e:2x2
jax: 0.10.0
libtpu: 0.0.40
codegen_flags: <defaults>
</compile_context>

<pallas_src>
import functools

import jax
import jax.numpy as jnp
from jax.experimental import pallas as pl
from jax.experimental.pallas import tpu as pltpu

_LANE = 128
_SUBLANE = 8
# 8192 rows * 128 lanes * 4 B = 4 MiB per f32 input block; 2 inputs x 2
# pipeline buffers = 16 MiB working set -> fits every generation with headroom.
_TILE_ROWS_MAX = 8192


def _vmem_limit_bytes() -> int:
    """Scoped-VMEM request derived from the actual chip generation."""
    try:
        cap = int(pltpu.get_tpu_info().vmem_capacity_bytes)
    except Exception:
        cap = 64 * 1024 * 1024  # conservative (v7x per-TensorCore) fallback
    return max(32 * 1024 * 1024, min(cap // 2, 64 * 1024 * 1024))


# --------------------------- per-element value fns ---------------------------


def _mse_val(o, t):
    # original: (10*o - 10*t)**2 / t / 10 * 100 == 1000 * (o - t)**2 / t ;
    # the x1000 is folded into the final scalar scale.
    d = o - t
    return d * d / t


def _sim_val(o, t):
    # original: |o - t| / t * 100 ; the x100 is folded into the final scale.
    return jnp.abs(o - t) / t


# --------------------------------- kernel ------------------------------------


def _make_reduce_kernel(value_fn, *, tile_r, k_per, valid_rows, need_mask):
    """Per-(batch-block, split) reduction over the innermost k grid axis.

    o_ref / t_ref blocks are (bb, tile_r, 128); out_ref is (1, 1, bb, 128) and
    stays resident across the "arbitrary" k axis, so it is used directly as
    the accumulator (zeroed at k == 0, no finalize copy).
    """

    def kernel(o_ref, t_ref, out_ref):
        s = pl.program_id(1)
        k = pl.program_id(2)

        @pl.when(k == 0)
        def _():
            out_ref[...] = jnp.zeros_like(out_ref)

        o = o_ref[...].astype(jnp.float32)          # (bb, tile_r, 128)
        t = t_ref[...].astype(jnp.float32)
        val = value_fn(o, t)
        if need_mask:
            # Rows past `valid_rows` in the (uneven) last tile hold unspecified
            # out-of-bounds data; select them to exactly 0 after the compute
            # (select never propagates the inf/nan the garbage may produce).
            row0 = (s * k_per + k) * tile_r
            rid = jax.lax.broadcasted_iota(jnp.int32, (tile_r, _LANE), 0)
            val = jnp.where((row0 + rid)[None] < valid_rows, val, 0.0)
        # sublane reduction rides the XLU slot (free filler); lanes stay dense.
        out_ref[...] += jnp.sum(val, axis=1).reshape(out_ref.shape)

    return kernel


# ------------------------------ pallas wrapper --------------------------------


def _pallas_main_sums(value_fn, tile_rows_max, o3, t3):
    """Per-batch f32 sums of value_fn over a (B, rows, 128) layout (rows >= 8)."""
    B, rows, lanes = o3.shape
    assert lanes == _LANE and rows >= _SUBLANE

    # Fold the batch into the block whenever it fits (the grid then only
    # iterates the reduction -> B x fewer ~0.35us grid steps).
    fold_b = B * _SUBLANE <= tile_rows_max
    bb = B if fold_b else 1
    b_blocks = B // bb

    # Row tile: multiple of 8, bounded so bb * tile_r <= tile_rows_max.
    per = max(_SUBLANE, (tile_rows_max // bb) // _SUBLANE * _SUBLANE)
    tile_r = min(per, (rows // _SUBLANE) * _SUBLANE)
    k_total = pl.cdiv(rows, tile_r)
    need_mask = (rows % tile_r) != 0

    # Split the reduction over a second *parallel* axis so both v7x
    # TensorCores are busy even when there is a single batch block.
    n_split = 2 if (b_blocks == 1 and k_total >= 2 and k_total % 2 == 0) else 1
    k_per = k_total // n_split

    kernel = _make_reduce_kernel(value_fn, tile_r=tile_r, k_per=k_per,
                                 valid_rows=rows, need_mask=need_mask)

    out = pl.pallas_call(
        kernel,
        out_shape=jax.ShapeDtypeStruct((b_blocks, n_split, bb, _LANE),
                                       jnp.float32),
        grid=(b_blocks, n_split, k_per),
        in_specs=[
            pl.BlockSpec((bb, tile_r, _LANE),
                         lambda b, s, k: (b, s * k_per + k, 0)),
            pl.BlockSpec((bb, tile_r, _LANE),
                         lambda b, s, k: (b, s * k_per + k, 0)),
        ],
        out_specs=pl.BlockSpec((1, 1, bb, _LANE),
                               lambda b, s, k: (b, s, 0, 0)),
        compiler_params=pltpu.CompilerParams(
            dimension_semantics=("parallel", "parallel", "arbitrary"),
            vmem_limit_bytes=_vmem_limit_bytes(),
        ),
    )(o3, t3)

    # Tiny final cross-lane / cross-split reduction in plain JAX: (B,).
    return jnp.sum(out, axis=(1, 3)).reshape(B)


@functools.partial(jax.jit, static_argnums=(0, 1, 2))
def _per_batch_metric(value_fn, scale, tile_rows_max, output, target):
    """(B,) per-batch values: scale * sum_{c,h,w} value_fn(output, target)."""
    B = output.shape[0]
    N = 1
    for d in output.shape[1:]:
        N *= d

    o2 = output.reshape(B, N)
    t2 = target.reshape(B, N)

    rows = N // _LANE
    n_main = rows * _LANE

    if rows < _SUBLANE:
        # Smaller than one (8, 128) tile per batch: plain JAX.
        # TODO(synk): for production, inputs below ~1 MiB total are also best
        # served by this path (pallas_call launch overhead dominates).
        sums = jnp.sum(value_fn(o2.astype(jnp.float32),
                                t2.astype(jnp.float32)), axis=-1)
        return sums * scale

    if n_main == N:
        o3 = o2.reshape(B, rows, _LANE)          # free: contiguous reshape
        t3 = t2.reshape(B, rows, _LANE)
        tail_sums = 0.0
    else:
        # <128-element tail per batch: reduced in plain JAX and added to the
        # kernel's partial sums (no full-array padding copies).
        o3 = o2[:, :n_main].reshape(B, rows, _LANE)
        t3 = t2[:, :n_main].reshape(B, rows, _LANE)
        tail_sums = jnp.sum(value_fn(o2[:, n_main:].astype(jnp.float32),
                                     t2[:, n_main:].astype(jnp.float32)),
                            axis=-1)

    main_sums = _pallas_main_sums(value_fn, tile_rows_max, o3, t3)
    return (main_sums + tail_sums) * scale


# ------------------------------ module wrapper --------------------------------


class IQAMetricPallas:
    """JAX/Pallas equivalent of IQA_Metric for metric_name in {'mse','similarity'}.

    No learnable parameters (the PyTorch module's __init__ only selects a
    metric function). Note: both metrics divide by `target` with no epsilon,
    exactly as the PyTorch reference does.
    """

    def __init__(self, metric_name: str, calc_mean: bool = True):
        if metric_name == "mse":
            self._value_fn = _mse_val
            self._numer = 1000.0
            self._global_mean_metric = False
        elif metric_name == "similarity":
            self._value_fn = _sim_val
            self._numer = 100.0
            self._global_mean_metric = True   # similarity() returns a scalar mean
        else:
            # TODO(synk): pyiqa.create_metric(...) backbones (LPIPS/NIQE/...) are
            # full pretrained networks with no in-script Pallas equivalent.
            raise NotImplementedError(f"metric {metric_name!r} not supported")
        self.calc_mean = calc_mean
        self.__name__ = metric_name
        self.tile_rows_max = _TILE_ROWS_MAX

    def __call__(self, output, target):
        assert output.shape == target.shape
        N = 1
        for d in output.shape[1:]:
            N *= d
        scale = float(self._numer) / float(N)
        per_batch = _per_batch_metric(self._value_fn, scale,
                                      int(self.tile_rows_max), output, target)
        if self._global_mean_metric:
            # equal per-batch element counts => mean of per-batch means == global mean
            return jnp.mean(per_batch)
        return jnp.mean(per_batch) if self.calc_mean else per_batch


# --------------------------- reference (plain JAX) ----------------------------


def _ref_mse(output, target, calc_mean=True):
    val = (output * 10.0 - target * 10.0) ** 2 / target / 10.0 * 100.0
    per_batch = jnp.mean(val.reshape(val.shape[0], -1), axis=-1)
    return jnp.mean(per_batch) if calc_mean else per_batch


def _ref_similarity(output, target):
    return jnp.mean(jnp.abs(output - target) / target * 100.0)


# ------------------------------------ main ------------------------------------


if __name__ == "__main__":
    def make_inputs(key, shape):
        k1, k2 = jax.random.split(key)
        # target stays away from zero (both metrics divide by target)
        target = jax.random.uniform(k1, shape, jnp.float32,
                                    minval=0.5, maxval=1.5)
        output = target + 0.1 * jax.random.normal(k2, shape, jnp.float32)
        return output, target

    key = jax.random.PRNGKey(0)
    k0, k1, k2 = jax.random.split(key, 3)
    ok = True

    # --- primary small shape (2, 4, 16, 16): N = 1024, zero-copy reshape path
    out1, tgt1 = make_inputs(k0, (2, 4, 16, 16))

    mse = IQAMetricPallas("mse", calc_mean=True)
    v = jax.block_until_ready(mse(out1, tgt1))
    ok &= bool(jnp.allclose(v, _ref_mse(out1, tgt1, True), rtol=1e-4, atol=1e-5))

    mse_nb = IQAMetricPallas("mse", calc_mean=False)
    v = jax.block_until_ready(mse_nb(out1, tgt1))
    ok &= bool(jnp.allclose(v, _ref_mse(out1, tgt1, False), rtol=1e-4, atol=1e-5))

    sim = IQAMetricPallas("similarity", calc_mean=True)
    v = jax.block_until_ready(sim(out1, tgt1))
    ok &= bool(jnp.allclose(v, _ref_similarity(out1, tgt1), rtol=1e-4, atol=1e-5))

    # --- shape with a <128-element tail (N = 1311): kernel main + JAX tail,
    #     masked last row-tile, 2-way parallel split of the reduction
    out2, tgt2 = make_inputs(k1, (2, 3, 19, 23))
    v = jax.block_until_ready(mse_nb(out2, tgt2))
    ok &= bool(jnp.allclose(v, _ref_mse(out2, tgt2, False), rtol=1e-4, atol=1e-5))

    # --- multi-tile reduction + split + masked last tile at a small shape
    #     (tiny tile cap only to exercise those kernel paths cheaply)
    out3, tgt3 = make_inputs(k2, (1, 3, 32, 60))   # N = 5760 -> rows = 45
    mse_tiny_tiles = IQAMetricPallas("mse", calc_mean=False)
    mse_tiny_tiles.tile_rows_max = 8               # K = 6, n_split = 2, mask on
    v = jax.block_until_ready(mse_tiny_tiles(out3, tgt3))
    ok &= bool(jnp.allclose(v, _ref_mse(out3, tgt3, False), rtol=1e-4, atol=1e-5))

    print("KERNEL_OK" if ok else "MISMATCH")
</pallas_src>

<mosaic_0001>
module attributes {stable_mosaic.version = 11 : i64} {
  func.func @kernel(%arg0: i32, %arg1: i32, %arg2: i32, %arg3: memref<2x8x128xf32, #tpu.memory_space<vmem>>, %arg4: memref<2x8x128xf32, #tpu.memory_space<vmem>>, %arg5: memref<1x1x2x128xf32, #tpu.memory_space<vmem>>) attributes {dimension_semantics = [#tpu.dimension_semantics<parallel>, #tpu.dimension_semantics<parallel>, #tpu.dimension_semantics<arbitrary>], iteration_bounds = array<i64: 1, 1, 1>, scalar_prefetch = 0 : i64, scratch_operands = 0 : i64, tpu.core_type = #tpu.core_type<tc>, window_params = [{transform_indices = @transform_0, window_bounds = array<i64: 2, 8, 128>}, {transform_indices = @transform_1, window_bounds = array<i64: 2, 8, 128>}, {transform_indices = @transform_2, window_bounds = array<i64: 1, 1, 2, 128>}]} {
    %c0_i32 = arith.constant 0 : i32
    %0 = arith.cmpi eq, %arg2, %c0_i32 : i32
    %1 = arith.extui %0 : i1 to i32
    %c0_i32_0 = arith.constant 0 : i32
    %2 = arith.cmpi ne, %1, %c0_i32_0 : i32
    scf.if %2 {
      %cst_14 = arith.constant 0.000000e+00 : f32
      %13 = vector.broadcast %cst_14 : f32 to vector<1x1x2x128xf32>
      %c0_15 = arith.constant 0 : index
      %c0_16 = arith.constant 0 : index
      %c0_17 = arith.constant 0 : index
      %c0_18 = arith.constant 0 : index
      %14 = vector.load %arg5[%c0_15, %c0_16, %c0_17, %c0_18] : memref<1x1x2x128xf32, #tpu.memory_space<vmem>>, vector<1x1x2x128xf32>
      tpu.vector_store %arg5[%c0_15, %c0_16, %c0_17, %c0_18], %13 {strides = array<i32>} : memref<1x1x2x128xf32, #tpu.memory_space<vmem>>, vector<1x1x2x128xf32>,
    } else {
    }
    %c0 = arith.constant 0 : index
    %c0_1 = arith.constant 0 : index
    %c0_2 = arith.constant 0 : index
    %3 = vector.load %arg3[%c0, %c0_1, %c0_2] : memref<2x8x128xf32, #tpu.memory_space<vmem>>, vector<2x8x128xf32>
    %c0_3 = arith.constant 0 : index
    %c0_4 = arith.constant 0 : index
    %c0_5 = arith.constant 0 : index
    %4 = vector.load %arg4[%c0_3, %c0_4, %c0_5] : memref<2x8x128xf32, #tpu.memory_space<vmem>>, vector<2x8x128xf32>
    %5 = arith.subf %3, %4 : vector<2x8x128xf32>
    %6 = arith.mulf %5, %5 : vector<2x8x128xf32>
    %7 = arith.divf %6, %4 : vector<2x8x128xf32>
    %c0_6 = arith.constant 0 : index
    %c0_7 = arith.constant 0 : index
    %c0_8 = arith.constant 0 : index
    %c0_9 = arith.constant 0 : index
    %8 = vector.load %arg5[%c0_6, %c0_7, %c0_8, %c0_9] : memref<1x1x2x128xf32, #tpu.memory_space<vmem>>, vector<1x1x2x128xf32>
    %cst = arith.constant dense<0.000000e+00> : vector<2x128xf32>
    %9 = vector.multi_reduction <add>, %7, %cst [1] : vector<2x8x128xf32> to vector<2x128xf32>
    %10 = vector.shape_cast %9 : vector<2x128xf32> to vector<1x1x2x128xf32>
    %11 = arith.addf %8, %10 : vector<1x1x2x128xf32>
    %c0_10 = arith.constant 0 : index
    %c0_11 = arith.constant 0 : index
    %c0_12 = arith.constant 0 : index
    %c0_13 = arith.constant 0 : index
    %12 = vector.load %arg5[%c0_10, %c0_11, %c0_12, %c0_13] : memref<1x1x2x128xf32, #tpu.memory_space<vmem>>, vector<1x1x2x128xf32>
    tpu.vector_store %arg5[%c0_10, %c0_11, %c0_12, %c0_13], %11 {strides = array<i32>} : memref<1x1x2x128xf32, #tpu.memory_space<vmem>>, vector<1x1x2x128xf32>,
    return
  }
  func.func @transform_0(%arg0: i32, %arg1: i32, %arg2: i32) -> (i32, i32, i32) {
    %c1_i32 = arith.constant 1 : i32
    %0 = arith.muli %arg1, %c1_i32 : i32
    %1 = arith.addi %0, %arg2 : i32
    %c0_i32 = arith.constant 0 : i32
    %c0_i32_0 = arith.constant 0 : i32
    return %arg0, %1, %c0_i32 : i32, i32, i32
  }
  func.func @transform_1(%arg0: i32, %arg1: i32, %arg2: i32) -> (i32, i32, i32) {
    %c1_i32 = arith.constant 1 : i32
    %0 = arith.muli %arg1, %c1_i32 : i32
    %1 = arith.addi %0, %arg2 : i32
    %c0_i32 = arith.constant 0 : i32
    %c0_i32_0 = arith.constant 0 : i32
    return %arg0, %1, %c0_i32 : i32, i32, i32
  }
  func.func @transform_2(%arg0: i32, %arg1: i32, %arg2: i32) -> (i32, i32, i32, i32) {
    %c0_i32 = arith.constant 0 : i32
    %c0_i32_0 = arith.constant 0 : i32
    %c0_i32_1 = arith.constant 0 : i32
    return %arg0, %arg1, %c0_i32, %c0_i32_0 : i32, i32, i32, i32
  }
}

</mosaic_0001>

<bundles_post_ra>
// kernel: _per_batch_metric.1
= control target key start
LH: loop header
LB: loop body
LE: loop exit
PB: predicated region body
PF: predicated region fallthrough
CT: control target
= control target key end

     0   :  { %v129_v0 = vmov 0.0   ;;  %vm103_vm8 = vcmask 1041409   ;;  %s166_s2 = inlined_call_operand.vmem [shape: f32[1,1,2,128], index: 2, kind: output, shape index: {}]   ;;  %s167_s1 = inlined_call_operand.vmem [shape: f32[2,8,128], index: 1, kind: input, shape index: {}]   ;;  %s168_s0 = inlined_call_operand.vmem [shape: f32[2,8,128], index: 0, kind: input, shape index: {}]  }
   0x1   :  { %49 = vst [vmem:[%s166_s2] sm:$0x3] %v129_v0  ;;  %v52_v1 = vld [vmem:[%s167_s1] sm:$0xff]  ;;  %v53_v2 = vld [vmem:[%s167_s1 + $0x8] sm:$0xff] }
   0x2   :  { %125 = vrcp.f32 %v52_v1  ;;  %v50_v3 = vld [vmem:[%s168_s0] sm:$0xff]  ;;  %v51_v5 = vld [vmem:[%s168_s0 + $0x8] sm:$0xff]  ;;  %vm63_vm0 = vweird.f32 %v52_v1  ;;  %v67_v9 = vand.u32 2147483647, %v52_v1  ;;  %v69_v10 = vand.u32 2147483648, %v52_v1 }
   0x3   :  { %127 = vrcp.f32 %v53_v2  ;;  %v54_v7 = vsub.f32 %v50_v3, %v52_v1  ;;  %v55_v12 = vsub.f32 %v51_v5, %v53_v2  ;;  %v84_v14 = vand.u32 2147483648, %v53_v2 }
   0x4   :  { %vm78_vm2 = vweird.f32 %v53_v2  ;;  %v82_v16 = vand.u32 2147483647, %v53_v2  ;;  %v70_v18 = vor.u32 1.1754944e-38, %v69_v10  ;;  %vm68_vm5 = vcmp.eq.f32.partialorder %v67_v9, 8.507059e+37 }
   0x5   :  { %v56_v20 = vmul.f32 %v54_v7, %v54_v7  ;;  %v85_v22 = vor.u32 1.1754944e-38, %v84_v14  ;;  %v57_v23 = vmul.f32 %v55_v12, %v55_v12 }
   0x6   :  { %vm83_vm7 = vcmp.eq.f32.partialorder %v82_v16, 8.507059e+37 }
   0x8   :  { %v126_v4 = vpop.eup %125  ;;  %v88_v42 = vld [vmem:[%s166_s2] sm:$0x3] }
   0x9   :  { %v128_v6 = vpop.eup %127  ;;  %v59_v8 = vmul.f32 %v126_v4, %v52_v1  ;;  %vm64_vm1 = vweird.f32 %v126_v4 }
   0xa   :  { %v74_v11 = vmul.f32 %v128_v6, %v53_v2  ;;  %vm79_vm3 = vweird.f32 %v128_v6  ;;  %vm65_vm4 = vmor %vm63_vm0, %vm64_vm1 }
   0xb   :  { %v60_v13 = vsub.f32 1.0, %v59_v8  ;;  %vm80_vm6 = vmor %vm78_vm2, %vm79_vm3 }
   0xc   :  { %v75_v15 = vsub.f32 1.0, %v74_v11 }
   0xd   :  { %v61_v17 = vmul.f32 %v126_v4, %v60_v13 }
   0xe   :  { %v76_v19 = vmul.f32 %v128_v6, %v75_v15 }
   0xf   :  { %v62_v21 = vadd.f32 %v126_v4, %v61_v17 }
  0x10   :  { %v77_v24 = vadd.f32 %v128_v6, %v76_v19 }
  0x11   :  { %v66_v25 = vsel %vm65_vm4, %v126_v4, %v62_v21 }
  0x12   :  { %v71_v26 = vsel %vm68_vm5, %v70_v18, %v66_v25  ;;  %v81_v27 = vsel %vm80_vm6, %v128_v6, %v77_v24 }
  0x13   :  { %v72_v28 = vmul.f32 %v71_v26, %v56_v20  ;;  %v86_v29 = vsel %vm83_vm7, %v85_v22, %v81_v27 }
  0x14   :  { %v87_v30 = vmul.f32 %v86_v29, %v57_v23 }
  0x15   :  { %v89_v31 = vrot.slane %v72_v28, 4 }
  0x16   :  { %v95_v32 = vrot.slane %v87_v30, 4 }
  0x17   :  { %v90_v33 = vadd.f32 %v89_v31, %v72_v28 }
  0x18   :  { %v96_v34 = vadd.f32 %v95_v32, %v87_v30 }
  0x19   :  { %v91_v35 = vrot.slane %v90_v33, 2 }
  0x1a   :  { %v97_v36 = vrot.slane %v96_v34, 2 }
  0x1b   :  { %v92_v37 = vadd.f32 %v91_v35, %v90_v33 }
  0x1c   :  { %v98_v38 = vadd.f32 %v97_v36, %v96_v34 }
  0x1d   :  { %v93_v39 = vrot.slane %v92_v37, 1 }
  0x1e   :  { %v99_v40 = vrot.slane %v98_v38, 1 }
  0x1f   :  { %v94_v41 = vadd.f32 %v93_v39, %v92_v37 }
  0x20   :  { %v100_v43 = vadd.f32 %v99_v40, %v98_v38 }
  0x22   :  { %v104_v44 = vsel %vm103_vm8, %v100_v43, %v94_v41 }
  0x23   :  { %v106_v45 = vadd.f32 %v104_v44, %v88_v42 }
  0x25   :  { %107 = vst [vmem:[%s166_s2] sm:$0x3] %v106_v45 }

</bundles_post_ra>
